<compile_context>
chip_gen: v7x
topology: tpu7x:2x2x1
jax: 0.10.0
libtpu: 0.0.40
codegen_flags: <defaults>
</compile_context>

<pallas_src>
import jax
import jax.numpy as jnp
from jax.experimental import pallas as pl
from jax.experimental.pallas import tpu as pltpu


def _round_up(x, m):
    return ((x + m - 1) // m) * m


def _make_kernel(H, W, C, NB):
    Hp, Wp = H + 2, W + 2
    L = Hp * Wp                        # flattened padded-image length
    Lpad = _round_up(L, 128)           # lane-dense, 128-aligned compute width
    M = _round_up(Wp + 1, 128)         # front/back margin, multiple of 128, >= Wp+1
    EXT = Lpad + 2 * M                 # extended flat scratch length
    NBC = NB * C                       # sublane-stacked (image, channel) rows
    K = 9 * NBC                        # im2col contraction size

    # Static lane offsets of the 9 taps inside the extended scratch.
    starts = [M + (dh - 1) * Wp + (dw - 1) for dh in range(3) for dw in range(3)]

    def kernel(mask_ref, x_ref, w1_ref, b1_ref, w2_ref, b2_ref,
               o_ref, xflat_ref, yflat_ref, col_ref):
        zmargin = jnp.zeros((NBC, M), jnp.bfloat16)
        # Re-zero only the always-zero margins, every step (megacore-safe).
        xflat_ref[:, 0:M] = zmargin
        xflat_ref[:, M + Lpad:EXT] = zmargin
        yflat_ref[:, 0:M] = zmargin
        yflat_ref[:, M + Lpad:EXT] = zmargin

        # Padded input image(s): one aligned, lane-dense store (wrapper pre-padded
        # the full halo and the L -> Lpad lane tail with zeros).
        xflat_ref[:, M:M + Lpad] = x_ref[0]

        def conv(src_ref, w, b):
            # im2col: stack the 9 lane-shifted tap slices along sublanes, then ONE
            # (NBC, K) @ (K, Lpad) MXU matmul with f32 accumulation inside the MXU.
            for t, s in enumerate(starts):
                col_ref[t * NBC:(t + 1) * NBC, :] = src_ref[:, s:s + Lpad]
            return jnp.dot(w, col_ref[...],
                           preferred_element_type=jnp.float32) + b    # (NBC, Lpad) f32

        mask = mask_ref[...]                                # (1, Lpad) f32, 1 on interior
        # y = relu(conv1(x)); interior mask zeroes halo + lane tail so y feeds conv2.
        y = jnp.maximum(conv(xflat_ref, w1_ref[...], b1_ref[...]), 0.0) * mask
        y_bf = y.astype(jnp.bfloat16)
        yflat_ref[:, M:M + Lpad] = y_bf                     # aligned, lane-dense store

        # out = relu(y + conv2(y)); residual reuses the in-register bf16-rounded y.
        z = conv(yflat_ref, w2_ref[...], b2_ref[...])
        o_ref[0] = jnp.maximum(y_bf.astype(jnp.float32) + z, 0.0).astype(o_ref.dtype)

    dims = dict(Hp=Hp, Wp=Wp, L=L, Lpad=Lpad, M=M, EXT=EXT, NBC=NBC, K=K)
    return kernel, dims


def _pack_conv_weight(w_hwio, nb):
    """HWIO (3,3,Cin,Cout) -> flat im2col weight (nb*Cout, 9*nb*Cin), block-diag over images."""
    C = w_hwio.shape[3]
    wt = jnp.transpose(w_hwio, (0, 1, 3, 2)).reshape(9, C, C)      # (tap, Cout, Cin)
    eye = jnp.eye(nb, dtype=wt.dtype)
    wblk = jnp.einsum('tuv,bd->butdv', wt, eye)                    # (nb,Cout,tap,nb,Cin)
    return wblk.reshape(nb * C, 9 * nb * C).astype(jnp.bfloat16)


def _choose_nb(n, c):
    """Images per grid step: fill f32 sublanes but keep >= 2 grid steps (v7x has 2 TCs)."""
    if n <= 1:
        return 1
    nb_fill = max(1, 8 // c)            # fill the 8 f32 sublanes
    nb_two_steps = (n + 1) // 2         # keep at least 2 grid steps
    return max(1, min(nb_fill, nb_two_steps, 8))


def residual_block(x_nchw, w1, b1, w2, b2):
    """x_nchw: (N, C, H, W) f32.  Weights HWIO (3, 3, C, C) f32, biases (C,) f32."""
    N, C, H, W = x_nchw.shape
    NB = _choose_nb(N, C)
    G = -(-N // NB)                                      # grid steps
    kernel, d = _make_kernel(H, W, C, NB)
    Hp, Wp, L, Lpad, NBC, K = d['Hp'], d['Wp'], d['L'], d['Lpad'], d['NBC'], d['K']

    # bf16 matmul operands (f32 accumulation inside the kernel); full zero halo plus
    # lane pad to Lpad so the kernel's interior store is one unmasked aligned block.
    xb = jnp.pad(x_nchw.astype(jnp.bfloat16),
                 ((0, G * NB - N), (0, 0), (1, 1), (1, 1)))        # (G*NB, C, Hp, Wp)
    x_flat = jnp.pad(xb.reshape(G * NB, C, L), ((0, 0), (0, 0), (0, Lpad - L)))
    x_flat = x_flat.reshape(G, NBC, Lpad)

    w1k = _pack_conv_weight(w1, NB)                                # (NBC, K) bf16
    w2k = _pack_conv_weight(w2, NB)
    b1k = jnp.tile(b1.reshape(1, C), (NB, 1)).reshape(NBC, 1).astype(jnp.float32)
    b2k = jnp.tile(b2.reshape(1, C), (NB, 1)).reshape(NBC, 1).astype(jnp.float32)

    # Interior mask in flat padded coords (1 inside, 0 on halo and on the lane tail).
    mask = jnp.zeros((Hp, Wp), jnp.float32).at[1:H + 1, 1:W + 1].set(1.0).reshape(1, L)
    mask = jnp.pad(mask, ((0, 0), (0, Lpad - L)))

    out_padded = pl.pallas_call(
        kernel,
        out_shape=jax.ShapeDtypeStruct((G, NBC, Lpad), jnp.float32),
        grid_spec=pltpu.PrefetchScalarGridSpec(
            num_scalar_prefetch=0,
            grid=(G,),
            in_specs=[
                pl.BlockSpec((1, Lpad), lambda n: (0, 0)),          # interior mask
                pl.BlockSpec((1, NBC, Lpad), lambda n: (n, 0, 0)),  # x (padded, flat)
                pl.BlockSpec((NBC, K), lambda n: (0, 0)),           # conv1 weight (flat)
                pl.BlockSpec((NBC, 1), lambda n: (0, 0)),           # conv1 bias
                pl.BlockSpec((NBC, K), lambda n: (0, 0)),           # conv2 weight (flat)
                pl.BlockSpec((NBC, 1), lambda n: (0, 0)),           # conv2 bias
            ],
            out_specs=pl.BlockSpec((1, NBC, Lpad), lambda n: (n, 0, 0)),
            scratch_shapes=[
                pltpu.VMEM((NBC, d['EXT']), jnp.bfloat16),   # padded x, flat + margins
                pltpu.VMEM((NBC, d['EXT']), jnp.bfloat16),   # padded y, flat + margins
                pltpu.VMEM((K, Lpad), jnp.bfloat16),         # im2col tap stack
            ],
        ),
        compiler_params=pltpu.CompilerParams(
            dimension_semantics=("parallel",)),
    )(mask, x_flat, w1k, b1k, w2k, b2k)

    # Crop lane padding, batch padding and the 1-pixel halo; layout stays NCHW.
    out = out_padded.reshape(G * NB, C, Lpad)[:N, :, :L]
    return out.reshape(N, C, Hp, Wp)[:, :, 1:H + 1, 1:W + 1]


def _reference(x_nchw, w1, b1, w2, b2):
    """Pure-JAX reference mirroring the kernel's bf16-operand / f32-accum math."""
    dn = ('NHWC', 'HWIO', 'NHWC')

    def conv(a, w, b):
        return jax.lax.conv_general_dilated(
            a, w, window_strides=(1, 1), padding='SAME', dimension_numbers=dn,
            preferred_element_type=jnp.float32) + b.reshape(1, 1, 1, -1)

    x = jnp.transpose(x_nchw, (0, 2, 3, 1)).astype(jnp.bfloat16)
    y = jax.nn.relu(conv(x, w1.astype(jnp.bfloat16), b1))
    yb = y.astype(jnp.bfloat16)      # kernel keeps y in bf16 for conv2 / residual
    out = jax.nn.relu(yb.astype(jnp.float32) + conv(yb, w2.astype(jnp.bfloat16), b2))
    return jnp.transpose(out, (0, 3, 1, 2))


if __name__ == "__main__":
    N, C, H, W = 2, 4, 16, 16
    key = jax.random.PRNGKey(0)
    kx, kw1, kb1, kw2, kb2 = jax.random.split(key, 5)

    x = jax.random.normal(kx, (N, C, H, W), dtype=jnp.float32)
    # Deterministic fan-in scaled params, HWIO layout (3, 3, Cin, Cout).
    scale = 1.0 / jnp.sqrt(9.0 * C)
    w1 = jax.random.normal(kw1, (3, 3, C, C), dtype=jnp.float32) * scale
    b1 = jax.random.normal(kb1, (C,), dtype=jnp.float32) * scale
    w2 = jax.random.normal(kw2, (3, 3, C, C), dtype=jnp.float32) * scale
    b2 = jax.random.normal(kb2, (C,), dtype=jnp.float32) * scale

    out = jax.block_until_ready(residual_block(x, w1, b1, w2, b2))
    ref = jax.block_until_ready(_reference(x, w1, b1, w2, b2))

    assert out.shape == (N, C, H, W)
    err = float(jnp.max(jnp.abs(out - ref)))
    assert jnp.allclose(out, ref, atol=2e-2, rtol=2e-2), err

    print("KERNEL_OK")
</pallas_src>

<mosaic_0001>
module attributes {stable_mosaic.version = 11 : i64} {
  func.func @kernel(%arg0: i32, %arg1: memref<1x384xf32, #tpu.memory_space<vmem>>, %arg2: memref<1x4x384xbf16, #tpu.memory_space<vmem>>, %arg3: memref<4x36xbf16, #tpu.memory_space<vmem>>, %arg4: memref<4x1xf32, #tpu.memory_space<vmem>>, %arg5: memref<4x36xbf16, #tpu.memory_space<vmem>>, %arg6: memref<4x1xf32, #tpu.memory_space<vmem>>, %arg7: memref<1x4x384xf32, #tpu.memory_space<vmem>>, %arg8: memref<4x640xbf16, #tpu.memory_space<vmem>>, %arg9: memref<4x640xbf16, #tpu.memory_space<vmem>>, %arg10: memref<36x384xbf16, #tpu.memory_space<vmem>>) attributes {dimension_semantics = [#tpu.dimension_semantics<parallel>], iteration_bounds = array<i64: 2>, scalar_prefetch = 0 : i64, scratch_operands = 3 : i64, tpu.core_type = #tpu.core_type<tc>, window_params = [{pipeline_mode = #tpu.pipeline_mode<synchronous>, transform_indices = @transform_0, window_bounds = array<i64: 1, 384>}, {transform_indices = @transform_1, window_bounds = array<i64: 1, 4, 384>}, {pipeline_mode = #tpu.pipeline_mode<synchronous>, transform_indices = @transform_2, window_bounds = array<i64: 4, 36>}, {pipeline_mode = #tpu.pipeline_mode<synchronous>, transform_indices = @transform_3, window_bounds = array<i64: 4, 1>}, {pipeline_mode = #tpu.pipeline_mode<synchronous>, transform_indices = @transform_4, window_bounds = array<i64: 4, 36>}, {pipeline_mode = #tpu.pipeline_mode<synchronous>, transform_indices = @transform_5, window_bounds = array<i64: 4, 1>}, {transform_indices = @transform_6, window_bounds = array<i64: 1, 4, 384>}]} {
    %cst = arith.constant 0.000000e+00 : bf16
    %0 = vector.broadcast %cst : bf16 to vector<4x128xbf16>
    %c0 = arith.constant 0 : index
    %c0_0 = arith.constant 0 : index
    %1 = vector.load %arg8[%c0, %c0_0] : memref<4x640xbf16, #tpu.memory_space<vmem>>, vector<4x128xbf16>
    tpu.vector_store %arg8[%c0, %c0_0], %0 {strides = array<i32>} : memref<4x640xbf16, #tpu.memory_space<vmem>>, vector<4x128xbf16>,
    %c0_1 = arith.constant 0 : index
    %c512 = arith.constant 512 : index
    %2 = vector.load %arg8[%c0_1, %c512] : memref<4x640xbf16, #tpu.memory_space<vmem>>, vector<4x128xbf16>
    tpu.vector_store %arg8[%c0_1, %c512], %0 {strides = array<i32>} : memref<4x640xbf16, #tpu.memory_space<vmem>>, vector<4x128xbf16>,
    %c0_2 = arith.constant 0 : index
    %c0_3 = arith.constant 0 : index
    %3 = vector.load %arg9[%c0_2, %c0_3] : memref<4x640xbf16, #tpu.memory_space<vmem>>, vector<4x128xbf16>
    tpu.vector_store %arg9[%c0_2, %c0_3], %0 {strides = array<i32>} : memref<4x640xbf16, #tpu.memory_space<vmem>>, vector<4x128xbf16>,
    %c0_4 = arith.constant 0 : index
    %c512_5 = arith.constant 512 : index
    %4 = vector.load %arg9[%c0_4, %c512_5] : memref<4x640xbf16, #tpu.memory_space<vmem>>, vector<4x128xbf16>
    tpu.vector_store %arg9[%c0_4, %c512_5], %0 {strides = array<i32>} : memref<4x640xbf16, #tpu.memory_space<vmem>>, vector<4x128xbf16>,
    %c0_6 = arith.constant 0 : index
    %c0_7 = arith.constant 0 : index
    %c0_8 = arith.constant 0 : index
    %5 = vector.load %arg2[%c0_6, %c0_7, %c0_8] : memref<1x4x384xbf16, #tpu.memory_space<vmem>>, vector<1x4x384xbf16>
    %6 = vector.shape_cast %5 : vector<1x4x384xbf16> to vector<4x384xbf16>
    %c0_9 = arith.constant 0 : index
    %c128 = arith.constant 128 : index
    %7 = vector.load %arg8[%c0_9, %c128] : memref<4x640xbf16, #tpu.memory_space<vmem>>, vector<4x384xbf16>
    tpu.vector_store %arg8[%c0_9, %c128], %6 {strides = array<i32>} : memref<4x640xbf16, #tpu.memory_space<vmem>>, vector<4x384xbf16>,
    %c0_10 = arith.constant 0 : index
    %c0_11 = arith.constant 0 : index
    %8 = vector.load %arg1[%c0_10, %c0_11] : memref<1x384xf32, #tpu.memory_space<vmem>>, vector<1x384xf32>
    %c0_12 = arith.constant 0 : index
    %c0_13 = arith.constant 0 : index
    %9 = vector.load %arg3[%c0_12, %c0_13] : memref<4x36xbf16, #tpu.memory_space<vmem>>, vector<4x36xbf16>
    %c0_14 = arith.constant 0 : index
    %c0_15 = arith.constant 0 : index
    %10 = vector.load %arg4[%c0_14, %c0_15] : memref<4x1xf32, #tpu.memory_space<vmem>>, vector<4x1xf32>
    %c0_16 = arith.constant 0 : index
    %c109 = arith.constant 109 : index
    %11 = vector.load %arg8[%c0_16, %c109] : memref<4x640xbf16, #tpu.memory_space<vmem>>, vector<4x384xbf16>
    %c0_17 = arith.constant 0 : index
    %c0_18 = arith.constant 0 : index
    %12 = vector.load %arg10[%c0_17, %c0_18] : memref<36x384xbf16, #tpu.memory_space<vmem>>, vector<4x384xbf16>
    tpu.vector_store %arg10[%c0_17, %c0_18], %11 {strides = array<i32>} : memref<36x384xbf16, #tpu.memory_space<vmem>>, vector<4x384xbf16>,
    %c0_19 = arith.constant 0 : index
    %c110 = arith.constant 110 : index
    %13 = vector.load %arg8[%c0_19, %c110] : memref<4x640xbf16, #tpu.memory_space<vmem>>, vector<4x384xbf16>
    %c4 = arith.constant 4 : index
    %c0_20 = arith.constant 0 : index
    %14 = vector.load %arg10[%c4, %c0_20] : memref<36x384xbf16, #tpu.memory_space<vmem>>, vector<4x384xbf16>
    tpu.vector_store %arg10[%c4, %c0_20], %13 {strides = array<i32>} : memref<36x384xbf16, #tpu.memory_space<vmem>>, vector<4x384xbf16>,
    %c0_21 = arith.constant 0 : index
    %c111 = arith.constant 111 : index
    %15 = vector.load %arg8[%c0_21, %c111] : memref<4x640xbf16, #tpu.memory_space<vmem>>, vector<4x384xbf16>
    %c8 = arith.constant 8 : index
    %c0_22 = arith.constant 0 : index
    %16 = vector.load %arg10[%c8, %c0_22] : memref<36x384xbf16, #tpu.memory_space<vmem>>, vector<4x384xbf16>
    tpu.vector_store %arg10[%c8, %c0_22], %15 {strides = array<i32>} : memref<36x384xbf16, #tpu.memory_space<vmem>>, vector<4x384xbf16>,
    %c0_23 = arith.constant 0 : index
    %c127 = arith.constant 127 : index
    %17 = vector.load %arg8[%c0_23, %c127] : memref<4x640xbf16, #tpu.memory_space<vmem>>, vector<4x384xbf16>
    %c12 = arith.constant 12 : index
    %c0_24 = arith.constant 0 : index
    %18 = vector.load %arg10[%c12, %c0_24] : memref<36x384xbf16, #tpu.memory_space<vmem>>, vector<4x384xbf16>
    tpu.vector_store %arg10[%c12, %c0_24], %17 {strides = array<i32>} : memref<36x384xbf16, #tpu.memory_space<vmem>>, vector<4x384xbf16>,
    %c0_25 = arith.constant 0 : index
    %c128_26 = arith.constant 128 : index
    %19 = vector.load %arg8[%c0_25, %c128_26] : memref<4x640xbf16, #tpu.memory_space<vmem>>, vector<4x384xbf16>
    %c16 = arith.constant 16 : index
    %c0_27 = arith.constant 0 : index
    %20 = vector.load %arg10[%c16, %c0_27] : memref<36x384xbf16, #tpu.memory_space<vmem>>, vector<4x384xbf16>
    tpu.vector_store %arg10[%c16, %c0_27], %19 {strides = array<i32>} : memref<36x384xbf16, #tpu.memory_space<vmem>>, vector<4x384xbf16>,
    %c0_28 = arith.constant 0 : index
    %c129 = arith.constant 129 : index
    %21 = vector.load %arg8[%c0_28, %c129] : memref<4x640xbf16, #tpu.memory_space<vmem>>, vector<4x384xbf16>
    %c20 = arith.constant 20 : index
    %c0_29 = arith.constant 0 : index
    %22 = vector.load %arg10[%c20, %c0_29] : memref<36x384xbf16, #tpu.memory_space<vmem>>, vector<4x384xbf16>
    tpu.vector_store %arg10[%c20, %c0_29], %21 {strides = array<i32>} : memref<36x384xbf16, #tpu.memory_space<vmem>>, vector<4x384xbf16>,
    %c0_30 = arith.constant 0 : index
    %c145 = arith.constant 145 : index
    %23 = vector.load %arg8[%c0_30, %c145] : memref<4x640xbf16, #tpu.memory_space<vmem>>, vector<4x384xbf16>
    %c24 = arith.constant 24 : index
    %c0_31 = arith.constant 0 : index
    %24 = vector.load %arg10[%c24, %c0_31] : memref<36x384xbf16, #tpu.memory_space<vmem>>, vector<4x384xbf16>
    tpu.vector_store %arg10[%c24, %c0_31], %23 {strides = array<i32>} : memref<36x384xbf16, #tpu.memory_space<vmem>>, vector<4x384xbf16>,
    %c0_32 = arith.constant 0 : index
    %c146 = arith.constant 146 : index
    %25 = vector.load %arg8[%c0_32, %c146] : memref<4x640xbf16, #tpu.memory_space<vmem>>, vector<4x384xbf16>
    %c28 = arith.constant 28 : index
    %c0_33 = arith.constant 0 : index
    %26 = vector.load %arg10[%c28, %c0_33] : memref<36x384xbf16, #tpu.memory_space<vmem>>, vector<4x384xbf16>
    tpu.vector_store %arg10[%c28, %c0_33], %25 {strides = array<i32>} : memref<36x384xbf16, #tpu.memory_space<vmem>>, vector<4x384xbf16>,
    %c0_34 = arith.constant 0 : index
    %c147 = arith.constant 147 : index
    %27 = vector.load %arg8[%c0_34, %c147] : memref<4x640xbf16, #tpu.memory_space<vmem>>, vector<4x384xbf16>
    %c32 = arith.constant 32 : index
    %c0_35 = arith.constant 0 : index
    %28 = vector.load %arg10[%c32, %c0_35] : memref<36x384xbf16, #tpu.memory_space<vmem>>, vector<4x384xbf16>
    tpu.vector_store %arg10[%c32, %c0_35], %27 {strides = array<i32>} : memref<36x384xbf16, #tpu.memory_space<vmem>>, vector<4x384xbf16>,
    %c0_36 = arith.constant 0 : index
    %c0_37 = arith.constant 0 : index
    %29 = vector.load %arg10[%c0_36, %c0_37] : memref<36x384xbf16, #tpu.memory_space<vmem>>, vector<36x384xbf16>
    %cst_38 = arith.constant dense<0.000000e+00> : vector<4x384xf32>
    %30 = tpu.matmul %9, %29, %cst_38 {dimension_numbers = #tpu.dot_dimension_numbers<[1], [0], [0], [1], [0, 0, 1, 1], [], []>} : vector<4x36xbf16>, vector<36x384xbf16>, vector<4x384xf32> -> vector<4x384xf32>
    %31 = vector.broadcast %10 : vector<4x1xf32> to vector<4x384xf32>
    %32 = arith.addf %30, %31 : vector<4x384xf32>
    %cst_39 = arith.constant 0.000000e+00 : f32
    %33 = vector.broadcast %cst_39 : f32 to vector<4x384xf32>
    %34 = arith.maximumf %32, %33 : vector<4x384xf32>
    %35 = vector.broadcast %8 : vector<1x384xf32> to vector<4x384xf32>
    %36 = arith.mulf %34, %35 : vector<4x384xf32>
    %37 = arith.truncf %36 : vector<4x384xf32> to vector<4x384xbf16>
    %c0_40 = arith.constant 0 : index
    %c128_41 = arith.constant 128 : index
    %38 = vector.load %arg9[%c0_40, %c128_41] : memref<4x640xbf16, #tpu.memory_space<vmem>>, vector<4x384xbf16>
    tpu.vector_store %arg9[%c0_40, %c128_41], %37 {strides = array<i32>} : memref<4x640xbf16, #tpu.memory_space<vmem>>, vector<4x384xbf16>,
    %c0_42 = arith.constant 0 : index
    %c0_43 = arith.constant 0 : index
    %39 = vector.load %arg5[%c0_42, %c0_43] : memref<4x36xbf16, #tpu.memory_space<vmem>>, vector<4x36xbf16>
    %c0_44 = arith.constant 0 : index
    %c0_45 = arith.constant 0 : index
    %40 = vector.load %arg6[%c0_44, %c0_45] : memref<4x1xf32, #tpu.memory_space<vmem>>, vector<4x1xf32>
    %c0_46 = arith.constant 0 : index
    %c109_47 = arith.constant 109 : index
    %41 = vector.load %arg9[%c0_46, %c109_47] : memref<4x640xbf16, #tpu.memory_space<vmem>>, vector<4x384xbf16>
    %c0_48 = arith.constant 0 : index
    %c0_49 = arith.constant 0 : index
    %42 = vector.load %arg10[%c0_48, %c0_49] : memref<36x384xbf16, #tpu.memory_space<vmem>>, vector<4x384xbf16>
    tpu.vector_store %arg10[%c0_48, %c0_49], %41 {strides = array<i32>} : memref<36x384xbf16, #tpu.memory_space<vmem>>, vector<4x384xbf16>,
    %c0_50 = arith.constant 0 : index
    %c110_51 = arith.constant 110 : index
    %43 = vector.load %arg9[%c0_50, %c110_51] : memref<4x640xbf16, #tpu.memory_space<vmem>>, vector<4x384xbf16>
    %c4_52 = arith.constant 4 : index
    %c0_53 = arith.constant 0 : index
    %44 = vector.load %arg10[%c4_52, %c0_53] : memref<36x384xbf16, #tpu.memory_space<vmem>>, vector<4x384xbf16>
    tpu.vector_store %arg10[%c4_52, %c0_53], %43 {strides = array<i32>} : memref<36x384xbf16, #tpu.memory_space<vmem>>, vector<4x384xbf16>,
    %c0_54 = arith.constant 0 : index
    %c111_55 = arith.constant 111 : index
    %45 = vector.load %arg9[%c0_54, %c111_55] : memref<4x640xbf16, #tpu.memory_space<vmem>>, vector<4x384xbf16>
    %c8_56 = arith.constant 8 : index
    %c0_57 = arith.constant 0 : index
    %46 = vector.load %arg10[%c8_56, %c0_57] : memref<36x384xbf16, #tpu.memory_space<vmem>>, vector<4x384xbf16>
    tpu.vector_store %arg10[%c8_56, %c0_57], %45 {strides = array<i32>} : memref<36x384xbf16, #tpu.memory_space<vmem>>, vector<4x384xbf16>,
    %c0_58 = arith.constant 0 : index
    %c127_59 = arith.constant 127 : index
    %47 = vector.load %arg9[%c0_58, %c127_59] : memref<4x640xbf16, #tpu.memory_space<vmem>>, vector<4x384xbf16>
    %c12_60 = arith.constant 12 : index
    %c0_61 = arith.constant 0 : index
    %48 = vector.load %arg10[%c12_60, %c0_61] : memref<36x384xbf16, #tpu.memory_space<vmem>>, vector<4x384xbf16>
    tpu.vector_store %arg10[%c12_60, %c0_61], %47 {strides = array<i32>} : memref<36x384xbf16, #tpu.memory_space<vmem>>, vector<4x384xbf16>,
    %c0_62 = arith.constant 0 : index
    %c128_63 = arith.constant 128 : index
    %49 = vector.load %arg9[%c0_62, %c128_63] : memref<4x640xbf16, #tpu.memory_space<vmem>>, vector<4x384xbf16>
    %c16_64 = arith.constant 16 : index
    %c0_65 = arith.constant 0 : index
    %50 = vector.load %arg10[%c16_64, %c0_65] : memref<36x384xbf16, #tpu.memory_space<vmem>>, vector<4x384xbf16>
    tpu.vector_store %arg10[%c16_64, %c0_65], %49 {strides = array<i32>} : memref<36x384xbf16, #tpu.memory_space<vmem>>, vector<4x384xbf16>,
    %c0_66 = arith.constant 0 : index
    %c129_67 = arith.constant 129 : index
    %51 = vector.load %arg9[%c0_66, %c129_67] : memref<4x640xbf16, #tpu.memory_space<vmem>>, vector<4x384xbf16>
    %c20_68 = arith.constant 20 : index
    %c0_69 = arith.constant 0 : index
    %52 = vector.load %arg10[%c20_68, %c0_69] : memref<36x384xbf16, #tpu.memory_space<vmem>>, vector<4x384xbf16>
    tpu.vector_store %arg10[%c20_68, %c0_69], %51 {strides = array<i32>} : memref<36x384xbf16, #tpu.memory_space<vmem>>, vector<4x384xbf16>,
    %c0_70 = arith.constant 0 : index
    %c145_71 = arith.constant 145 : index
    %53 = vector.load %arg9[%c0_70, %c145_71] : memref<4x640xbf16, #tpu.memory_space<vmem>>, vector<4x384xbf16>
    %c24_72 = arith.constant 24 : index
    %c0_73 = arith.constant 0 : index
    %54 = vector.load %arg10[%c24_72, %c0_73] : memref<36x384xbf16, #tpu.memory_space<vmem>>, vector<4x384xbf16>
    tpu.vector_store %arg10[%c24_72, %c0_73], %53 {strides = array<i32>} : memref<36x384xbf16, #tpu.memory_space<vmem>>, vector<4x384xbf16>,
    %c0_74 = arith.constant 0 : index
    %c146_75 = arith.constant 146 : index
    %55 = vector.load %arg9[%c0_74, %c146_75] : memref<4x640xbf16, #tpu.memory_space<vmem>>, vector<4x384xbf16>
    %c28_76 = arith.constant 28 : index
    %c0_77 = arith.constant 0 : index
    %56 = vector.load %arg10[%c28_76, %c0_77] : memref<36x384xbf16, #tpu.memory_space<vmem>>, vector<4x384xbf16>
    tpu.vector_store %arg10[%c28_76, %c0_77], %55 {strides = array<i32>} : memref<36x384xbf16, #tpu.memory_space<vmem>>, vector<4x384xbf16>,
    %c0_78 = arith.constant 0 : index
    %c147_79 = arith.constant 147 : index
    %57 = vector.load %arg9[%c0_78, %c147_79] : memref<4x640xbf16, #tpu.memory_space<vmem>>, vector<4x384xbf16>
    %c32_80 = arith.constant 32 : index
    %c0_81 = arith.constant 0 : index
    %58 = vector.load %arg10[%c32_80, %c0_81] : memref<36x384xbf16, #tpu.memory_space<vmem>>, vector<4x384xbf16>
    tpu.vector_store %arg10[%c32_80, %c0_81], %57 {strides = array<i32>} : memref<36x384xbf16, #tpu.memory_space<vmem>>, vector<4x384xbf16>,
    %c0_82 = arith.constant 0 : index
    %c0_83 = arith.constant 0 : index
    %59 = vector.load %arg10[%c0_82, %c0_83] : memref<36x384xbf16, #tpu.memory_space<vmem>>, vector<36x384xbf16>
    %cst_84 = arith.constant dense<0.000000e+00> : vector<4x384xf32>
    %60 = tpu.matmul %39, %59, %cst_84 {dimension_numbers = #tpu.dot_dimension_numbers<[1], [0], [0], [1], [0, 0, 1, 1], [], []>} : vector<4x36xbf16>, vector<36x384xbf16>, vector<4x384xf32> -> vector<4x384xf32>
    %61 = vector.broadcast %40 : vector<4x1xf32> to vector<4x384xf32>
    %62 = arith.addf %60, %61 : vector<4x384xf32>
    %63 = arith.extf %37 : vector<4x384xbf16> to vector<4x384xf32>
    %64 = arith.addf %63, %62 : vector<4x384xf32>
    %cst_85 = arith.constant 0.000000e+00 : f32
    %65 = vector.broadcast %cst_85 : f32 to vector<4x384xf32>
    %66 = arith.maximumf %64, %65 : vector<4x384xf32>
    %c0_86 = arith.constant 0 : index
    %c0_87 = arith.constant 0 : index
    %c0_88 = arith.constant 0 : index
    %67 = vector.load %arg7[%c0_86, %c0_87, %c0_88] : memref<1x4x384xf32, #tpu.memory_space<vmem>>, vector<1x4x384xf32>
    %68 = vector.shape_cast %67 : vector<1x4x384xf32> to vector<4x384xf32>
    %69 = vector.shape_cast %66 : vector<4x384xf32> to vector<1x4x384xf32>
    tpu.vector_store %arg7[%c0_86, %c0_87, %c0_88], %69 {strides = array<i32>} : memref<1x4x384xf32, #tpu.memory_space<vmem>>, vector<1x4x384xf32>,
    return
  }
  func.func @transform_0(%arg0: i32) -> (i32, i32) {
    %c0_i32 = arith.constant 0 : i32
    %c0_i32_0 = arith.constant 0 : i32
    %c0_i32_1 = arith.constant 0 : i32
    return %c0_i32, %c0_i32_0 : i32, i32
  }
  func.func @transform_1(%arg0: i32) -> (i32, i32, i32) {
    %c0_i32 = arith.constant 0 : i32
    %c0_i32_0 = arith.constant 0 : i32
    %c0_i32_1 = arith.constant 0 : i32
    return %arg0, %c0_i32, %c0_i32_0 : i32, i32, i32
  }
  func.func @transform_2(%arg0: i32) -> (i32, i32) {
    %c0_i32 = arith.constant 0 : i32
    %c0_i32_0 = arith.constant 0 : i32
    %c0_i32_1 = arith.constant 0 : i32
    return %c0_i32, %c0_i32_0 : i32, i32
  }
  func.func @transform_3(%arg0: i32) -> (i32, i32) {
    %c0_i32 = arith.constant 0 : i32
    %c0_i32_0 = arith.constant 0 : i32
    %c0_i32_1 = arith.constant 0 : i32
    return %c0_i32, %c0_i32_0 : i32, i32
  }
  func.func @transform_4(%arg0: i32) -> (i32, i32) {
    %c0_i32 = arith.constant 0 : i32
    %c0_i32_0 = arith.constant 0 : i32
    %c0_i32_1 = arith.constant 0 : i32
    return %c0_i32, %c0_i32_0 : i32, i32
  }
  func.func @transform_5(%arg0: i32) -> (i32, i32) {
    %c0_i32 = arith.constant 0 : i32
    %c0_i32_0 = arith.constant 0 : i32
    %c0_i32_1 = arith.constant 0 : i32
    return %c0_i32, %c0_i32_0 : i32, i32
  }
  func.func @transform_6(%arg0: i32) -> (i32, i32, i32) {
    %c0_i32 = arith.constant 0 : i32
    %c0_i32_0 = arith.constant 0 : i32
    %c0_i32_1 = arith.constant 0 : i32
    return %arg0, %c0_i32, %c0_i32_0 : i32, i32, i32
  }
}

</mosaic_0001>

<bundles_post_ra>
// kernel: tpu_custom_call.1
= control target key start
LH: loop header
LB: loop body
LE: loop exit
PB: predicated region body
PF: predicated region fallthrough
CT: control target
= control target key end

     0   :  { %11 = vsyncpa [#allocation6], 0  ;;  %s1855_s0 = inlined_call_operand.hbm [shape: f32[1,384], index: 0, kind: input, shape index: {}]   ;;  %s1856_s1 = inlined_call_operand.vmem [shape: bf16[2,4,384], index: 1, kind: input, shape index: {}]   ;;  %s1857_s2 = inlined_call_operand.vmem [shape: bf16[4,36], index: 2, kind: input, shape index: {}]   ;;  %s1858_s3 = inlined_call_operand.vmem [shape: f32[4,1], index: 3, kind: input, shape index: {}]   ;;  %s1859_s4 = inlined_call_operand.vmem [shape: bf16[4,36], index: 4, kind: input, shape index: {}]   ;;  %s1860_s5 = inlined_call_operand.vmem [shape: f32[4,1], index: 5, kind: input, shape index: {}]   ;;  %s1861_s6 = inlined_call_operand.hbm [shape: f32[2,4,384], index: 6, kind: output, shape index: {}]  }
   0x1   :  { %12 = vsyncpa [#allocation7], 0 }
   0x2   :  { %14 = vsyncpa [#allocation7 + $0x1], 0  ;;  %s1561_s21 = smov 0   ;;  %s1563_s22 = smov 0  }
   0x3   :  { %s1565_s23 = smov 0   ;;  %s1567_s24 = smov 0  }
   0x4 LB: > { %s1582_s25 = sadd.s32 4294967295, %s1510_s24   ;;  %s1251_s26 = sadd.s32 4294967294, %s1510_s24   ;;  %s1510_s24 = sphi %s1567_s24, %s1877_s24   ;;  %s1506_s23 = sphi %s1565_s23, %s1876_s23   ;;  %s1502_s22 = sphi %s1563_s22, %s1875_s22   ;;  %s1498_s21 = sphi %s1561_s21, %s1874_s21  }
   0x5   : > { %s1586_s27 = sadd.s32 1, %s1510_s24   ;;  %s158_s28 = sadd.s32 1, %s1506_s23 }
   0x6   : > { %s155_s29 = ssub.s32 %s1510_s24, %s1586_s27  ;;  %p168_p0 = scmp.ne.s32.totalorder %s1506_s23, %s1502_s22 }
   0x7   : > { %p156_p1 = scmp.eq.s32.totalorder %s155_s29, 0  ;;  %p169_p2 = scmp.eq.s32.totalorder %s1582_s25, 1 }
   0x8   : > { %p174_p3 = scmp.ne.s32.totalorder %s1502_s22, %s1498_s21  ;;  %p175_p4 = scmp.eq.s32.totalorder %s1251_s26, 1 }
   0x9   : > { %s1597_s30 = scalar_select %p156_p1, %s1506_s23, %s158_s28  }
   0xa   : > { %p1599_p5 = por %p169_p2, %p168_p0  ;;  %p1603_p6 = por %p175_p4, %p174_p3 }
   0xb   : > { %p1252_p7 = scmp.ge.s32.totalorder %s1510_s24, 1  ;;  %p182_p8 = scmp.lt.s32.totalorder %s1510_s24, 3 }
   0xc   : > { %s1865_s7 = scalar_select %p1599_p5, 1, 0 }
   0xd   : > { %s1866_s8 = scalar_select %p1603_p6, 1, 0 }
   0xe   : > { %p1862_p9 = scmp.eq.s32.totalorder %s1582_s25, 0  ;;  %p1610_p10 = pnand %p1252_p7, %p182_p8 }
   0xf   : > { %s1512_s10 = smov [#allocation5]   ;;  %s1416_s15 = scalar_lea.hbm %s1855_s0, 48 }
  0x10   : > { %s1867_s9 = scalar_select %p1610_p10, 1, 0 }
  0x11   : > { %s195_s11 = sshll.u32 %s1512_s10, 4  ;;  %p1327_p11 = pneg %p1610_p10  ;;  %s196_s11 = int_to_ptr.vmem [resolvable:$true] %s195_s11 }
  0x12   : > { %p1417_p13 = scmp.ne.s32.totalorder %s1855_s0, %s1416_s15  ;;  %p1423_p3 = scmp.lt.u32.totalorder %s1416_s15, %s1855_s0 }
  0x13   : > { %p1618_p12 = pnand %p1862_p9, %p1327_p11 }
  0x15   : > { %p1418_p0 = pneg %p1618_p12 }
  0x17   : > { %p1419_p1 = pnand %p1418_p0, %p1417_p13 }
  0x19   : > { %p1420_p2 = pneg %p1419_p1 }
  0x1b   : > { %p1425_p4 = pnand %p1423_p3, %p1420_p2 }
  0x1d   : > { %1428 = shalt.err (!%p1425_p4)
}
  0x1e   : > { %s1429_s20 = scalar_lea.vmem %s196_s11, 48  ;;  %s1436_s26 = scalar_lea.vmem %s196_s11, 64 }
  0x1f   : > { %p1430_p7 = scmp.ne.s32.totalorder %s196_s11, %s1429_s20  ;;  %p1437_p9 = scmp.lt.s32.totalorder %s196_s11, %s196_s11 }
  0x20   : > { %p1438_p6 = scmp.lt.s32.totalorder %s1436_s26, %s1429_s20 }
  0x21   : > { %p1432_p8 = pnand %p1430_p7, %p1418_p0 }
  0x22   : > { %p1439_p5 = por %p1438_p6, %p1437_p9 }
  0x23   : > { %p1433_p11 = pneg %p1432_p8 }
  0x25   : > { %p1440_p10 = pnand %p1439_p5, %p1433_p11 }
  0x27   : > { %1443 = shalt.err (!%p1440_p10)
}
  0x28   : > { %1330 = dma.hbm_to_vmem [thread:$0]  (!%p1618_p12), %s1855_s0, 48, %s196_s11, [#allocation6]  }
  0x29   : > { %p1869_p13 = scmp.ne.s32.totalorder %s1867_s9, 0 }
  0x2a   : > { %p1870_p1 = scmp.eq.s32.totalorder (!%p1869_p13), %s1582_s25, 0 }
  0x2b   : > { %228 = sbr.rel (%p1869_p13) target bundleno = 866 (0x362), region = 44 }
  0x32   : > { %1489 = dma.done.wait (%p1870_p1), [#allocation6], 48   ;;  %p1871_p0 = pmov %p1870_p1 }
  0x33   : > { %p258_p6 = scmp.lt.s32.totalorder %s1582_s25, 1  ;;  %v1513_v0 = vmov 0   ;;  %v1514_v1 = vmov 1983009808   ;;  %v279_v3 = vlaneseq  ;;  %s1515_s14 = smov 18   ;;  %v1521_v20 = vmov 0.0  }
  0x34   : > { %1491 = vsyncadd (%p1871_p0), [#allocation6], 4294967248  ;;  %264 = vst [vmem:[#allocation2] sm:$0x3] %v1513_v0  ;;  %644 = vmatprep.mubr.bf16.mxu0 %v1513_v0  ;;  %1383 = vset.pattern.permute.xlu0 %v1513_v0  ;;  %v277_v2 = vunpack.c.l.s4 %v1514_v1  ;;  %s1516_s15 = smov 19   ;;  %s1517_s16 = smov 1  }
  0x35   : > { %265 = vst [vmem:[#allocation2 + $0x8] sm:$0x3] %v1513_v0  ;;  %266 = vst [vmem:[#allocation3] sm:$0x3] %v1513_v0  ;;  %s259_s9 = scalar_select %p258_p6, %s1582_s25, 1  ;;  %v1655_v6 = vshrl.u32 %v279_v3, 7  ;;  %1298 = vmatprep.subr.bf16.mxu1 %v1521_v20 }
  0x36   : > { %267 = vst [vmem:[#allocation3 + $0x8] sm:$0x3] %v1513_v0  ;;  %v278_v5 = vunpack.c.0.s8 %v277_v2  ;;  %s1518_s17 = smov 17   ;;  %s1519_s18 = smov 127   ;;  %vm1524_vm0 = vmmov 0   ;;  %vm329_vm1 = vcmask 146432  }
  0x37   : > { %s1319_s10 = smul.u32 6, %s259_s9  ;;  %s1520_s19 = smov 111   ;;  %1304 = vmatprep.mubr.msk.bf16.mxu1 %vm1524_vm0, %v1521_v20  ;;  %v272_v23 = vld [vmem:[%s1858_s3] sm:$0xf]  ;;  %vm391_vm2 = vcmask 7168   ;;  %vm443_vm3 = vcmask 1039360  }
  0x38   : > { %v1658_v7 = vsub.s32 %v278_v5, %v1655_v6  ;;  %s1522_s20 = smov 110   ;;  %s1523_s26 = smov 109   ;;  %vm296_vm4 = vcmask 1043456   ;;  %vm298_vm5 = vcmask 154624   ;;  %vm360_vm6 = vcmask 138240  }
  0x39   : > { %s262_s13 = scalar_lea.vmem %s1856_s1, %s1319_s10  ;;  %vm474_vm7 = vcmask 908288   ;;  %vm505_vm8 = vcmask 900096   ;;  %vm536_vm9 = vcmask 891904   ;;  %vm602_vm10 = vcmask 1041408   ;;  %p1872_p9 = scmp.ne.s32.totalorder %s1865_s7, 0 }
  0x3a   : > { %v268_v4 = vld [vmem:[%s262_s13] sm:$0x3f]  ;;  %vm598_vm11 = vcmask 293888   ;;  %s1525_s9 = smov [#allocation8]  }
  0x3b   : > { %269 = vst [vmem:[#allocation2 + $0x2] sm:$0x3f] %v268_v4  ;;  %s1448_s10 = sshll.u32 %s1525_s9, 4  ;;  %s1449_s10 = int_to_ptr.vmem [resolvable:$false] %s1448_s10 }
  0x3c   : > { %s1450_s11 = scalar_lea.vmem %s1449_s10, 384 }
  0x42   : > { %v305_v8 = vld [vmem:[#allocation2] sm:$0xff] }
  0x43   : > { %v398_v9 = vld [vmem:[#allocation2 + $0x2] sm:$0x3f]  ;;  %v321_v10 = vrot.slane %v305_v8, %v1658_v7  ;;  %v307_v13 = vcombine.low %v305_v8, %v305_v8  ;;  %v275_v14 = vcombine.high %v305_v8, %v305_v8 }
  0x44   : > { %1258 = vst.sshfl [vmem:[#allocation4 + $0x18] sm:$0xf pattern:$0x76325410] %v398_v9  ;;  %v400_v11 = vcombine.high %v398_v9, %v398_v9  ;;  %v419_v12 = vld [vmem:[#allocation2 + $0x2] sm:$0xff] }
  0x45   : > { %324 = vrot.lane.b32.xlu1 %v321_v10, %s1515_s14  ;;  %290 = vrot.lane.b32.xlu0 %v321_v10, %s1516_s15  ;;  %v435_v15 = vrot.slane %v419_v12, %v1658_v7  ;;  %v314_v16 = vrot.slane %v307_v13, %v1658_v7  ;;  %v289_v17 = vrot.slane %v275_v14, %v1658_v7 }
  0x46   : > { %1259 = vst.sshfl [vmem:[#allocation4 + $0x20] sm:$0x3 pattern:$0x76325410] %v400_v11  ;;  %v452_v18 = vcombine.high %v419_v12, %v419_v12  ;;  %v421_v19 = vcombine.low %v419_v12, %v419_v12 }
  0x48   : > { %v466_v21 = vrot.slane %v452_v18, %v1658_v7  ;;  %v428_v22 = vrot.slane %v421_v19, %v1658_v7 }
  0x49   : > { %386 = vrot.lane.b32.xlu1 %v321_v10, %s1517_s16  ;;  %353 = vrot.lane.b32.xlu0 %v321_v10, %s1518_s17 }
  0x4d   : > { %438 = vrot.lane.b32.xlu1 %v435_v15, %s1519_s18  ;;  %467 = vrot.lane.b32.xlu0 %v435_v15, %s1520_s19 }
  0x51   : > { %322 = vrot.lane.b32.xlu1 %v314_v16, %s1515_s14  ;;  %292 = vrot.lane.b32.xlu0 %v289_v17, %s1516_s15 }
  0x55   : > { %355 = vrot.lane.b32.xlu1 %v289_v17, %s1518_s17  ;;  %384 = vrot.lane.b32.xlu0 %v314_v16, %s1517_s16 }
  0x59   : > { %469 = vrot.lane.b32.xlu1 %v466_v21, %s1520_s19  ;;  %436 = vrot.lane.b32.xlu0 %v428_v22, %s1519_s18 }
  0x5d   : > { %500 = vrot.lane.b32.xlu1 %v435_v15, %s1522_s20  ;;  %498 = vrot.lane.b32.xlu0 %v428_v22, %s1522_s20 }
  0x61   : > { %531 = vrot.lane.b32.xlu1 %v466_v21, %s1523_s26  ;;  %529 = vrot.lane.b32.xlu0 %v435_v15, %s1523_s26 }
  0x65   : > { %555 = vperm.xlu0 %1383, %v272_v23  }
  0xb7   : > { %v325_v24 = vpop.permute.xlu1 %324  ;;  %v291_v25 = vpop.permute.xlu0 %290 }
  0xb8   : > { %v327_v26 = vrot.slane %v325_v24, 4  ;;  %v294_v38 = vrot.slane %v291_v25, 4 }
  0xba   : > { %v331_v27 = vsel %vm329_vm1, %v325_v24, %v327_v26 }
  0xbb   : > { %335 = vst [vmem:[#allocation4 + $0x8] sm:$0xc] %v331_v27  ;;  %v387_v28 = vpop.permute.xlu1 %386  ;;  %v354_v29 = vpop.permute.xlu0 %353 }
  0xbc   : > { %v389_v30 = vrot.slane %v387_v28, 4  ;;  %v357_v48 = vrot.slane %v354_v29, 4 }
  0xbe   : > { %v393_v31 = vsel %vm391_vm2, %v387_v28, %v389_v30 }
  0xbf   : > { %397 = vst [vmem:[#allocation4 + $0x14] sm:$0xc] %v393_v31  ;;  %v439_v32 = vpop.permute.xlu1 %438  ;;  %v468_v33 = vpop.permute.xlu0 %467  ;;  %v271_v31 = vld [vmem:[%s1857_s2] sm:$0x3] }
  0xc0   : > { %v441_v34 = vrot.slane %v439_v32, 4  ;;  %v471_v58 = vrot.slane %v468_v33, 4 }
  0xc2   : > { %v445_v35 = vsel %vm443_vm3, %v439_v32, %v441_v34 }
  0xc3   : > { %449 = vst [vmem:[#allocation4 + $0x20] sm:$0xc] %v445_v35  ;;  %v323_v36 = vpop.permute.xlu1 %322  ;;  %v293_v37 = vpop.permute.xlu0 %292 }
  0xc4   : > { %v326_v39 = vrot.slane %v323_v36, 4  ;;  %v295_v40 = vrot.slane %v293_v37, 4 }
  0xc6   : > { %v328_v41 = vsel %vm296_vm4, %v326_v39, %v327_v26  ;;  %v297_v42 = vsel %vm296_vm4, %v294_v38, %v295_v40  ;;  %v300_v43 = vsel %vm298_vm5, %v293_v37, %v295_v40  ;;  %v703_v38 = vsub.s32 1, %v1655_v6 }
  0xc7   : > { %v330_v44 = vsel %vm329_vm1, %v323_v36, %v328_v41  ;;  %v299_v45 = vsel %vm298_vm5, %v291_v25, %v297_v42  ;;  %304 = vst [vmem:[#allocation4 + $0x8] sm:$0x3] %v300_v43  ;;  %v356_v46 = vpop.permute.xlu1 %355  ;;  %v385_v47 = vpop.permute.xlu0 %384  ;;  %v699_v36 = vsub.s32 0, %v1655_v6 }
  0xc8   : > { %334 = vst [vmem:[#allocation4] sm:$0xcc] %v330_v44  ;;  %303 = vst [vmem:[#allocation4] sm:$0x33] %v299_v45  ;;  %v358_v49 = vrot.slane %v356_v46, 4  ;;  %v388_v50 = vrot.slane %v385_v47, 4 }
  0xca   : > { %v359_v51 = vsel %vm296_vm4, %v357_v48, %v358_v49  ;;  %v362_v52 = vsel %vm360_vm6, %v356_v46, %v358_v49  ;;  %v390_v53 = vsel %vm296_vm4, %v388_v50, %v389_v30 }
  0xcb   : > { %v361_v54 = vsel %vm360_vm6, %v354_v29, %v359_v51  ;;  %366 = vst [vmem:[#allocation4 + $0x14] sm:$0x3] %v362_v52  ;;  %v392_v55 = vsel %vm391_vm2, %v385_v47, %v390_v53  ;;  %v470_v56 = vpop.permute.xlu1 %469  ;;  %v437_v57 = vpop.permute.xlu0 %436 }
  0xcc   : > { %365 = vst [vmem:[#allocation4 + $0xc] sm:$0x33] %v361_v54  ;;  %396 = vst [vmem:[#allocation4 + $0xc] sm:$0xcc] %v392_v55  ;;  %v472_v59 = vrot.slane %v470_v56, 4  ;;  %v440_v60 = vrot.slane %v437_v57, 4 }
  0xce   : > { %v473_v61 = vsel %vm296_vm4, %v471_v58, %v472_v59  ;;  %v476_v62 = vsel %vm474_vm7, %v470_v56, %v472_v59  ;;  %v442_v63 = vsel %vm296_vm4, %v440_v60, %v441_v34  ;;  %v270_v34 = vld [vmem:[#allocation5] sm:$0x7] }
  0xcf   : > { %v475_v1 = vsel %vm474_vm7, %v468_v33, %v473_v61  ;;  %480 = vst [vmem:[#allocation4 + $0x2c] sm:$0x3] %v476_v62  ;;  %v444_v2 = vsel %vm443_vm3, %v437_v57, %v442_v63  ;;  %v501_v3 = vpop.permute.xlu1 %500  ;;  %v499_v4 = vpop.permute.xlu0 %498  ;;  %v707_v33 = vsub.s32 2, %v1655_v6  ;;  %v700_v44 = vrot.slane %v270_v34, %v699_v36 }
  0xd0   : > { %479 = vst [vmem:[#allocation4 + $0x24] sm:$0x33] %v475_v1  ;;  %448 = vst [vmem:[#allocation4 + $0x18] sm:$0xcc] %v444_v2  ;;  %v503_v5 = vrot.slane %v501_v3, 4  ;;  %v502_v8 = vrot.slane %v499_v4, 4  ;;  %v704_v49 = vrot.slane %v270_v34, %v703_v38 }
  0xd1   : > { %v708_v40 = vrot.slane %v270_v34, %v707_v33 }
  0xd2   : > { %v507_v9 = vsel %vm505_vm8, %v501_v3, %v503_v5  ;;  %v504_v10 = vsel %vm296_vm4, %v502_v8, %v503_v5  ;;  %v1388_v11 = vld [vmem:[#allocation4 + $0x8] ss:$12 sps:$4 sm:$0xff]  }
  0xd3   : > { %511 = vst [vmem:[#allocation4 + $0x2c] sm:$0xc] %v507_v9  ;;  %v506_v12 = vsel %vm505_vm8, %v499_v4, %v504_v10  ;;  %v532_v13 = vpop.permute.xlu1 %531  ;;  %v530_v14 = vpop.permute.xlu0 %529  ;;  %v1389_v15 = vld [vmem:[#allocation4 + $0x4] ss:$12 sps:$4 sm:$0xff]   ;;  %v1391_v16 = vld [vmem:[#allocation4] ss:$12 sps:$4 sm:$0xff]   ;;  %1299 = vmatpush3.bf16.msra.mxu1 %v1388_v11 }
  0xd4   : > { %510 = vst [vmem:[#allocation4 + $0x24] sm:$0xcc] %v506_v12  ;;  %v534_v17 = vrot.slane %v532_v13, 4  ;;  %v533_v18 = vrot.slane %v530_v14, 4  ;;  %612 = vmatprep.subr.bf16.mxu0 %v1389_v15  ;;  %1300 = vmatprep.subr.bf16.mxu1 %v1521_v20 }
  0xd5   : > { %613 = vmatpush1.bf16.msra.mxu0 %v1391_v16 }
  0xd6   : > { %v538_v19 = vsel %vm536_vm9, %v532_v13, %v534_v17  ;;  %v535_v21 = vsel %vm296_vm4, %v533_v18, %v534_v17  ;;  %v740_v13 = vld [vmem:[%s1860_s5] sm:$0xf] }
  0xd7   : > { %542 = vst [vmem:[#allocation4 + $0x38] sm:$0x3] %v538_v19  ;;  %v537_v22 = vsel %vm536_vm9, %v530_v14, %v535_v21 }
  0xd8   : > { %541 = vst [vmem:[#allocation4 + $0x30] sm:$0x33] %v537_v22 }
  0xda   : > { %v1393_v23 = vld [vmem:[#allocation4 + $0x20] ss:$12 sps:$4 sm:$0xff]  }
  0xdb   : > { %v1394_v24 = vld [vmem:[#allocation4 + $0x1c] ss:$12 sps:$4 sm:$0xff]   ;;  %v1396_v25 = vld [vmem:[#allocation4 + $0x18] ss:$12 sps:$4 sm:$0xff]   ;;  %1301 = vmatpush3.bf16.msra.mxu1 %v1393_v23 }
  0xdc   : > { %614 = vmatprep.subr.bf16.mxu0 %v1394_v24  ;;  %1302 = vmatprep.subr.bf16.mxu1 %v1521_v20 }
  0xdd   : > { %615 = vmatpush1.bf16.msra.mxu0 %v1396_v25 }
  0xde   : > { %v1398_v26 = vld [vmem:[#allocation4 + $0x38] ss:$0 sps:$4 sm:$0x33]  }
  0xdf   : > { %v551_v27 = vld [vmem:[#allocation4 + $0x30] sm:$0x33]  ;;  %v610_v29 = vsel %vm602_vm10, %v1398_v26, 0 }
  0xe0   : > { %v1267_v28 = vcombine.high %v551_v27, %v551_v27  ;;  %v1266_v30 = vcombine.low %v551_v27, %v551_v27  ;;  %1303 = vmatpush3.bf16.msra.mxu1 %v610_v29 }
  0xe1   : > { %1308 = vmatprep.subr.bf16.mxu1 %v1521_v20 }
  0xe2   : > { %1269 = vmatprep.subr.msk.bf16.mxu0 %vm602_vm10, %v1267_v28  ;;  %v604_v32 = vsel %vm602_vm10, %v1266_v30, 0 }
  0xe3   : > { %617 = vmatpush1.bf16.msra.mxu0 %v604_v32  ;;  %1305 = vmatmul.mubr.msk.bf16.vlgmr.msra.gmra.mrb[0].mxu1 %vm598_vm11, %v271_v31 }
  0xe4   : > { %1314 = vmatprep.mubr.msk.bf16.mxu1 %vm1524_vm0, %v1521_v20  ;;  %v556_v35 = vpop.permute.xlu0 %555 }
  0xe6   : > { %1270 = vmatmul.mubr.msk.bf16.vlgmr.msra.gmra.mrb[0].mxu0 %vm598_vm11, %v271_v31 }
  0xe7   : > { %1101 = vmatprep.mubr.bf16.mxu0 %v1513_v0 }
 0x1b6   : > { %v687_v37 = vpop.f32.mrb[0].mxu1 }
 0x1b7   : > { %v1306_v39 = vpop.f32.mrb[1].mxu1  ;;  %v688_v41 = vadd.f32 %v687_v37, %v556_v35 }
 0x1b8   : > { %v690_v43 = vpop.f32.mrb[2].mxu1 }
 0x1b9   : > { %v646_v42 = vpop.f32.mrb[0].mxu0  ;;  %v695_v46 = vmax.f32 %v688_v41, 0.0  ;;  %v1307_v48 = vpop.f32.mrb[3].mxu1 }
 0x1ba   : > { %v647_v45 = vadd.f32 %v646_v42, %v556_v35  ;;  %v648_v47 = vpop.f32.mrb[1].mxu0 }
 0x1bb   : > { %v649_v0 = vadd.f32 %v648_v47, %v556_v35  ;;  %v650_v50 = vpop.f32.mrb[2].mxu0  ;;  %v714_v52 = vmul.f32 %v708_v40, %v695_v46 }
 0x1bc   : > { %v693_v51 = vmax.f32 %v647_v45, 0.0  ;;  %v651_v53 = vpop.f32.mrb[3].mxu0 }
 0x1bd   : > { %v694_v54 = vmax.f32 %v649_v0, 0.0  ;;  %v1731_v6 = vpack.c.bf16 %v714_v52, %v714_v52 }
 0x1be   : > { %v1729_v55 = vmul.f32 %v700_v44, %v693_v51 }
 0x1bf   : > { %v1733_v56 = vmul.f32 %v704_v49, %v694_v54  ;;  %v735_v57 = vrot.slane %v1731_v6, %v1658_v7 }
 0x1c1   : > { %v1272_v58 = vpack.c.bf16 %v1733_v56, %v1729_v55 }
 0x1c3   : > { %v728_v59 = vrot.slane %v1272_v58, %v1658_v7 }
 0x1c5   : > { %v736_v60 = vcombine.low %v728_v59, %v735_v57 }
 0x1c7   : > { %738 = vst [vmem:[#allocation3 + $0x2] sm:$0x3f] %v736_v60 }
 0x1ce   : > { %v861_v61 = vld [vmem:[#allocation3 + $0x2] sm:$0x3f] }
 0x1cf   : > { %v801_v62 = vld [vmem:[#allocation3] sm:$0xff]  ;;  %v863_v63 = vcombine.high %v861_v61, %v861_v61  ;;  %1273 = vst.sshfl [vmem:[#allocation4 + $0x18] sm:$0xf pattern:$0x76325410] %v861_v61 }
 0x1d0   : > { %v810_v1 = vrot.slane %v801_v62, %v1658_v7  ;;  %v912_v2 = vld [vmem:[#allocation3 + $0x2] sm:$0xff]  ;;  %v773_v4 = vcombine.low %v801_v62, %v801_v62  ;;  %v743_v10 = vcombine.high %v801_v62, %v801_v62 }
 0x1d1   : > { %1274 = vst.sshfl [vmem:[#allocation4 + $0x20] sm:$0x3 pattern:$0x76325410] %v863_v63  ;;  %v921_v3 = vrot.slane %v912_v2, %v1658_v7  ;;  %v884_v8 = vcombine.low %v912_v2, %v912_v2  ;;  %v914_v12 = vcombine.high %v912_v2, %v912_v2 }
 0x1d2   : > { %818 = vrot.lane.b32.xlu0 %v810_v1, %s1518_s17  ;;  %758 = vrot.lane.b32.xlu1 %v810_v1, %s1516_s15  ;;  %v780_v5 = vrot.slane %v773_v4, %v1658_v7  ;;  %v757_v11 = vrot.slane %v743_v10, %v1658_v7 }
 0x1d3   : > { %v891_v9 = vrot.slane %v884_v8, %v1658_v7  ;;  %v928_v14 = vrot.slane %v914_v12, %v1658_v7 }
 0x1d6   : > { %929 = vrot.lane.b32.xlu0 %v921_v3, %s1520_s19  ;;  %790 = vrot.lane.b32.xlu1 %v810_v1, %s1515_s14 }
 0x1da   : > { %788 = vrot.lane.b32.xlu0 %v780_v5, %s1515_s14  ;;  %850 = vrot.lane.b32.xlu1 %v810_v1, %s1517_s16 }
 0x1de   : > { %848 = vrot.lane.b32.xlu0 %v780_v5, %s1517_s16  ;;  %901 = vrot.lane.b32.xlu1 %v921_v3, %s1519_s18 }
 0x1e2   : > { %899 = vrot.lane.b32.xlu0 %v891_v9, %s1519_s18  ;;  %961 = vrot.lane.b32.xlu1 %v921_v3, %s1522_s20 }
 0x1e6   : > { %959 = vrot.lane.b32.xlu0 %v891_v9, %s1522_s20  ;;  %760 = vrot.lane.b32.xlu1 %v757_v11, %s1516_s15  ;;  %s255_s15 = sand.u32 1, %s1502_s22  }
 0x1e7   : > { %s1318_s16 = smul.u32 12, %s255_s15  ;;  %s1166_s29 = scalar_lea.sflag [#allocation7], %s255_s15 }
 0x1e9   : > { %s257_s18 = scalar_lea.vmem [#allocation8], %s1318_s16 }
 0x1ea   : > { %989 = vrot.lane.b32.xlu0 %v921_v3, %s1523_s26  ;;  %820 = vrot.lane.b32.xlu1 %v757_v11, %s1518_s17  ;;  %s1320_s17 = smul.u32 192, %s1582_s25 }
 0x1ec   : > { %s1811_s28 = scalar_lea.hbm %s1861_s6, %s1320_s17 }
 0x1ee   : > { %1014 = vperm.xlu0 %1383, %v740_v13   ;;  %931 = vrot.lane.b32.xlu1 %v928_v14, %s1520_s19  ;;  %s1180_s19 = sshll.u32 %s257_s18, 4  ;;  %s1813_s19 = int_to_ptr.vmem [resolvable:$true] %s1180_s19 }
 0x1ef   : > { %s1444_s25 = scalar_lea.vmem %s1813_s19, 192  ;;  %p1451_p2 = scmp.lt.s32.totalorder %s1813_s19, %s1449_s10 }
 0x1f0   : > { %p1445_p5 = scmp.ne.s32.totalorder %s1813_s19, %s1444_s25  ;;  %p1452_p3 = scmp.lt.s32.totalorder %s1450_s11, %s1444_s25 }
 0x1f2   : > { %991 = vrot.lane.b32.xlu1 %v928_v14, %s1523_s26  ;;  %p1446_p10 = pnand %p1445_p5, %p1872_p9  ;;  %p1453_p4 = por %p1452_p3, %p1451_p2 }
 0x1f4   : > { %p1447_p12 = pneg %p1446_p10 }
 0x1f6   : > { %p1454_p7 = pnand %p1453_p4, %p1447_p12 }
 0x244   : > { %v819_v15 = vpop.permute.xlu0 %818  ;;  %v759_v16 = vpop.permute.xlu1 %758 }
 0x245   : > { %v762_v44 = vrot.slane %v759_v16, 4  ;;  %v822_v52 = vrot.slane %v819_v15, 4 }
 0x248   : > { %v930_v17 = vpop.permute.xlu0 %929  ;;  %v791_v18 = vpop.permute.xlu1 %790 }
 0x249   : > { %v793_v19 = vrot.slane %v791_v18, 4  ;;  %v933_v60 = vrot.slane %v930_v17, 4 }
 0x24b   : > { %v796_v21 = vsel %vm329_vm1, %v791_v18, %v793_v19 }
 0x24c   : > { %800 = vst [vmem:[#allocation4 + $0x8] sm:$0xc] %v796_v21  ;;  %v789_v22 = vpop.permute.xlu0 %788  ;;  %v851_v23 = vpop.permute.xlu1 %850 }
 0x24d   : > { %v792_v24 = vrot.slane %v789_v22, 4  ;;  %v853_v25 = vrot.slane %v851_v23, 4 }
 0x24f   : > { %v794_v26 = vsel %vm296_vm4, %v792_v24, %v793_v19  ;;  %v856_v7 = vsel %vm391_vm2, %v851_v23, %v853_v25  ;;  %v739_v23 = vld [vmem:[%s1859_s4] sm:$0x3] }
 0x250   : > { %v795_v27 = vsel %vm329_vm1, %v789_v22, %v794_v26  ;;  %860 = vst [vmem:[#allocation4 + $0x14] sm:$0xc] %v856_v7  ;;  %v849_v28 = vpop.permute.xlu0 %848  ;;  %v902_v29 = vpop.permute.xlu1 %901  ;;  %v716_v7 = vpack.c.bf16 %v1733_v56, %v1733_v56 }
 0x251   : > { %799 = vst [vmem:[#allocation4] sm:$0xcc] %v795_v27  ;;  %v852_v30 = vrot.slane %v849_v28, 4  ;;  %v904_v31 = vrot.slane %v902_v29, 4 }
 0x253   : > { %v854_v32 = vsel %vm296_vm4, %v852_v30, %v853_v25  ;;  %v907_v33 = vsel %vm443_vm3, %v902_v29, %v904_v31 }
 0x254   : > { %v855_v34 = vsel %vm391_vm2, %v849_v28, %v854_v32  ;;  %911 = vst [vmem:[#allocation4 + $0x20] sm:$0xc] %v907_v33  ;;  %v900_v35 = vpop.permute.xlu0 %899  ;;  %v962_v36 = vpop.permute.xlu1 %961  ;;  %v1152_v28 = vunpack.c.l.bf16 %v1731_v6 }
 0x255   : > { %859 = vst [vmem:[#allocation4 + $0xc] sm:$0xcc] %v855_v34  ;;  %v903_v37 = vrot.slane %v900_v35, 4  ;;  %v964_v38 = vrot.slane %v962_v36, 4 }
 0x257   : > { %v905_v39 = vsel %vm296_vm4, %v903_v37, %v904_v31  ;;  %v967_v40 = vsel %vm505_vm8, %v962_v36, %v964_v38  ;;  %v1151_v37 = vunpack.c.l.bf16 %v716_v7 }
 0x258   : > { %v906_v41 = vsel %vm443_vm3, %v900_v35, %v905_v39  ;;  %971 = vst [vmem:[#allocation4 + $0x2c] sm:$0xc] %v967_v40  ;;  %v960_v42 = vpop.permute.xlu0 %959  ;;  %v761_v43 = vpop.permute.xlu1 %760 }
 0x259   : > { %910 = vst [vmem:[#allocation4 + $0x18] sm:$0xcc] %v906_v41  ;;  %v963_v45 = vrot.slane %v960_v42, 4  ;;  %v763_v46 = vrot.slane %v761_v43, 4 }
 0x25b   : > { %v965_v47 = vsel %vm296_vm4, %v963_v45, %v964_v38  ;;  %v764_v48 = vsel %vm296_vm4, %v762_v44, %v763_v46  ;;  %v766_v0 = vsel %vm298_vm5, %v761_v43, %v763_v46 }
 0x25c   : > { %v966_v49 = vsel %vm505_vm8, %v960_v42, %v965_v47  ;;  %v765_v50 = vsel %vm298_vm5, %v759_v16, %v764_v48  ;;  %770 = vst [vmem:[#allocation4 + $0x8] sm:$0x3] %v766_v0  ;;  %v821_v51 = vpop.permute.xlu1 %820  ;;  %v990_v62 = vpop.permute.xlu0 %989 }
 0x25d   : > { %970 = vst [vmem:[#allocation4 + $0x24] sm:$0xcc] %v966_v49  ;;  %769 = vst [vmem:[#allocation4] sm:$0x33] %v765_v50  ;;  %v823_v53 = vrot.slane %v821_v51, 4  ;;  %v993_v4 = vrot.slane %v990_v62, 4 }
 0x25f   : > { %v824_v54 = vsel %vm296_vm4, %v822_v52, %v823_v53  ;;  %v826_v57 = vsel %vm360_vm6, %v821_v51, %v823_v53 }
 0x260   : > { %v825_v58 = vsel %vm360_vm6, %v819_v15, %v824_v54  ;;  %830 = vst [vmem:[#allocation4 + $0x14] sm:$0x3] %v826_v57  ;;  %v932_v59 = vpop.permute.xlu1 %931 }
 0x261   : > { %829 = vst [vmem:[#allocation4 + $0xc] sm:$0x33] %v825_v58  ;;  %v934_v61 = vrot.slane %v932_v59, 4 }
 0x263   : > { %v935_v63 = vsel %vm296_vm4, %v933_v60, %v934_v61  ;;  %v937_v1 = vsel %vm474_vm7, %v932_v59, %v934_v61 }
 0x264   : > { %v936_v2 = vsel %vm474_vm7, %v930_v17, %v935_v63  ;;  %941 = vst [vmem:[#allocation4 + $0x2c] sm:$0x3] %v937_v1  ;;  %v992_v3 = vpop.permute.xlu1 %991 }
 0x265   : > { %940 = vst [vmem:[#allocation4 + $0x24] sm:$0x33] %v936_v2  ;;  %v994_v5 = vrot.slane %v992_v3, 4 }
 0x267   : > { %v995_v8 = vsel %vm296_vm4, %v993_v4, %v994_v5  ;;  %v997_v9 = vsel %vm536_vm9, %v992_v3, %v994_v5  ;;  %v1405_v10 = vld [vmem:[#allocation4 + $0x8] ss:$12 sps:$4 sm:$0xff]  }
 0x268   : > { %v996_v11 = vsel %vm536_vm9, %v990_v62, %v995_v8  ;;  %1001 = vst [vmem:[#allocation4 + $0x38] sm:$0x3] %v997_v9  ;;  %v1406_v12 = vld [vmem:[#allocation4] ss:$12 sps:$4 sm:$0xff]   ;;  %v1408_v13 = vld [vmem:[#allocation4 + $0x4] ss:$12 sps:$4 sm:$0xff]   ;;  %1309 = vmatpush3.bf16.msra.mxu1 %v1405_v10 }
 0x269   : > { %1000 = vst [vmem:[#allocation4 + $0x30] sm:$0x33] %v996_v11  ;;  %1069 = vmatprep.subr.bf16.mxu0 %v1408_v13  ;;  %1310 = vmatprep.subr.bf16.mxu1 %v1521_v20 }
 0x26a   : > { %1070 = vmatpush1.bf16.msra.mxu0 %v1406_v12 }
 0x26b   : > { %v1409_v14 = vld [vmem:[#allocation4 + $0x20] ss:$12 sps:$4 sm:$0xff]  }
 0x26c   : > { %v1410_v15 = vld [vmem:[#allocation4 + $0x18] ss:$12 sps:$4 sm:$0xff]   ;;  %v1412_v16 = vld [vmem:[#allocation4 + $0x1c] ss:$12 sps:$4 sm:$0xff]   ;;  %1311 = vmatpush3.bf16.msra.mxu1 %v1409_v14 }
 0x26d   : > { %1071 = vmatprep.subr.bf16.mxu0 %v1412_v16  ;;  %1312 = vmatprep.subr.bf16.mxu1 %v1521_v20  ;;  %v715_v20 = vpack.c.bf16 %v1729_v55, %v1729_v55  ;;  %v1015_v25 = vpop.permute.xlu0 %1014 }
 0x26e   : > { %1072 = vmatpush1.bf16.msra.mxu0 %v1410_v15 }
 0x26f   : > { %v1414_v17 = vld [vmem:[#allocation4 + $0x38] ss:$0 sps:$4 sm:$0x33]   ;;  %v1150_v34 = vunpack.c.l.bf16 %v715_v20 }
 0x270   : > { %v1010_v18 = vld [vmem:[#allocation4 + $0x30] sm:$0x33]  ;;  %v1067_v21 = vsel %vm602_vm10, %v1414_v17, 0 }
 0x271   : > { %v1282_v19 = vcombine.high %v1010_v18, %v1010_v18  ;;  %v1281_v22 = vcombine.low %v1010_v18, %v1010_v18  ;;  %1313 = vmatpush3.bf16.msra.mxu1 %v1067_v21 }
 0x273   : > { %1284 = vmatprep.subr.msk.bf16.mxu0 %vm602_vm10, %v1282_v19  ;;  %v1061_v24 = vsel %vm602_vm10, %v1281_v22, 0 }
 0x274   : > { %1074 = vmatpush1.bf16.msra.mxu0 %v1061_v24  ;;  %1315 = vmatmul.mubr.msk.bf16.vlgmr.msra.gmra.mrb[4].mxu1 %vm598_vm11, %v739_v23 }
 0x277   : > { %1285 = vmatmul.mubr.msk.bf16.vlgmr.msra.gmra.mrb[4].mxu0 %vm598_vm11, %v739_v23 }
 0x347   : > { %v1144_v26 = vpop.f32.mrb[4].mxu1 }
 0x348   : > { %v1145_v27 = vadd.f32 %v1144_v26, %v1015_v25  ;;  %v1316_v29 = vpop.f32.mrb[5].mxu1 }
 0x349   : > { %v1147_v31 = vpop.f32.mrb[6].mxu1 }
 0x34a   : > { %v1103_v30 = vpop.f32.mrb[4].mxu0  ;;  %v1155_v32 = vadd.f32 %v1152_v28, %v1145_v27  ;;  %v1317_v36 = vpop.f32.mrb[7].mxu1 }
 0x34b   : > { %v1104_v33 = vadd.f32 %v1103_v30, %v1015_v25  ;;  %v1105_v35 = vpop.f32.mrb[5].mxu0 }
 0x34c   : > { %v1106_v55 = vadd.f32 %v1105_v35, %v1015_v25  ;;  %v1107_v38 = vpop.f32.mrb[6].mxu0  ;;  %v1158_v39 = vmax.f32 %v1155_v32, 0.0 }
 0x34d   : > { %v1153_v40 = vadd.f32 %v1150_v34, %v1104_v33  ;;  %v1108_v56 = vpop.f32.mrb[7].mxu0 }
 0x34e   : > { %v1154_v41 = vadd.f32 %v1151_v37, %v1106_v55  ;;  %1164 = vst [vmem:[%s257_s18 + $0x8] sm:$0xf] %v1158_v39 }
 0x34f   : > { %v1156_v6 = vmax.f32 %v1153_v40, 0.0 }
 0x350   : > { %v1157_v42 = vmax.f32 %v1154_v41, 0.0 }
 0x352   : > { %v1161_v43 = vcombine.low %v1156_v6, %v1157_v42 }
 0x354   : > { %1163 = vst [vmem:[%s257_s18] sm:$0xff] %v1161_v43 }
 0x355   : > { %1457 = shalt.err (!%p1454_p7)
}
 0x356   : > { %s1458_s12 = scalar_lea.hbm %s1811_s28, 192  ;;  %s1462_s15 = scalar_lea.hbm %s1861_s6, 384 }
 0x357   : > { %p1459_p8 = scmp.ne.s32.totalorder %s1811_s28, %s1458_s12  ;;  %p1463_p1 = scmp.lt.u32.totalorder %s1811_s28, %s1861_s6 }
 0x358   : > { %p1464_p0 = scmp.lt.u32.totalorder %s1462_s15, %s1458_s12  ;;  %p1466_p5 = scmp.lt.u32.totalorder %s1458_s12, %s1811_s28 }
 0x359   : > { %p1460_p11 = pnand %p1459_p8, %p1872_p9 }
 0x35a   : > { %p1465_p6 = por %p1464_p0, %p1463_p1 }
 0x35b   : > { %p1461_p13 = pneg %p1460_p11 }
 0x35c   : > { %p1467_p10 = por %p1466_p5, %p1465_p6 }
 0x35e   : > { %p1468_p12 = pnand %p1467_p10, %p1461_p13 }
 0x360   : > { %1471 = shalt.err (!%p1468_p12)
}
 0x361   : > { %1325 = dma.vmem_to_hbm [thread:$0]  (%p1872_p9), %s1813_s19, 192, %s1811_s28, %s1166_s29  }
 0x362 PF: > { %p1337_p2 = scmp.ge.s32.totalorder %s1510_s24, 2  ;;  %s1192_s18 = sand.u32 1, %s1498_s21  }
 0x363   : > { %p1873_p3 = scmp.ne.s32.totalorder %s1866_s8, 0  ;;  %s1193_s20 = scalar_lea.sflag [#allocation7], %s1192_s18 }
 0x365   : > { %p1332_p4 = pnand %p1337_p2, %p1873_p3 }
 0x367   : > { %1493 = dma.done.wait (!%p1332_p4), %s1193_s20, 192  }
 0x368   : > { %1495 = vsyncadd (!%p1332_p4), %s1193_s20, 4294967104  ;;  %p17_p7 = scmp.ge.s32.totalorder %s1586_s27, 4   ;;  %s1874_s21 = smov %s1502_s22 }
 0x369   : > { %s1875_s22 = smov %s1506_s23  ;;  %s1876_s23 = smov %s1597_s30 }
 0x36a   : > { %s1877_s24 = smov %s1586_s27  ;;  %19 = sbr.rel (!%p17_p7) target bundleno = 4 (0x4), region = 84 }
 0x371   :  { %1198 = vsyncpa [#allocation6], 1 }
 0x372   :  { %1200 = vsyncpa [#allocation6 + $0x1], 1 }
 0x373   :  { %1201 = vsyncpa [#allocation7], 1 }
 0x374   :  { %1203 = vsyncpa [#allocation7 + $0x1], 1 }

</bundles_post_ra>
